<compile_context>
chip_gen: v7x
topology: tpu7x:2x2x1
jax: 0.10.0
libtpu: 0.0.40
codegen_flags: <defaults>
</compile_context>

<pallas_src>
import functools

import jax
import jax.numpy as jnp
from jax.experimental import pallas as pl
from jax.experimental.pallas import tpu as pltpu  # noqa: F401  (TPU backend)

# -------------------------- small, module-consistent config -------------------
BATCH    = 2
SEQ      = 8
DIM      = 32
HEADS    = 2
DIM_HEAD = 16
INNER    = HEADS * DIM_HEAD          # 32


# ----------------------------------- kernel -----------------------------------
def _attention_kernel(x_ref, wqkv_ref, wo_ref, bo_ref, cos_ref, sin_ref, rot_ref,
                      o_ref, *, batch, seq, heads, dim_head):
    B, n, H, dh = batch, seq, heads, dim_head
    inner = H * dh
    scale = dh ** -0.5

    x2d = x_ref[...]                                       # (B*n, dim) in VMEM

    # --- fused Q/K/V projection: ONE lane-dense MXU push (16x32 @ 32x96) ------
    qkv = jnp.dot(x2d, wqkv_ref[...],
                  preferred_element_type=jnp.float32)      # (B*n, 3*inner)
    q2d = qkv[:, :inner]
    k2d = qkv[:, inner:2 * inner]
    v2d = qkv[:, 2 * inner:]

    # --- RoPE in the lane-dense 2D layout --------------------------------------
    # rotate_half(t) == t @ rot  (block-diagonal signed permutation, built in prep)
    cos = cos_ref[...]                                     # (B*n, inner)
    sin = sin_ref[...]
    rot = rot_ref[...]                                     # (inner, inner)
    q2d = q2d * cos + jnp.dot(q2d, rot, preferred_element_type=jnp.float32) * sin
    k2d = k2d * cos + jnp.dot(k2d, rot, preferred_element_type=jnp.float32) * sin

    # --- grouped (batch,head) attention -----------------------------------------
    # Only here do we go to the (G, n, dh) layout needed by the score/PV einsums.
    def group(t2d):                                        # (B*n, inner) -> (G, n, dh)
        return jnp.stack([t2d[b * n:(b + 1) * n, h * dh:(h + 1) * dh]
                          for b in range(B) for h in range(H)], axis=0)

    q_g, k_g, v_g = group(q2d), group(k2d), group(v2d)     # (G, n, dh), G = B*H

    s = jnp.einsum('gqd,gkd->gqk', q_g, k_g,
                   preferred_element_type=jnp.float32) * scale   # (G, n, n)
    m = jnp.max(s, axis=-1, keepdims=True)
    e = jnp.exp(s - m)
    l = jnp.sum(e, axis=-1, keepdims=True)
    p = e * pl.reciprocal(l, approx=True)                  # divide on the EUP slot

    o_g = jnp.einsum('gqk,gkd->gqd', p, v_g,
                     preferred_element_type=jnp.float32)   # (G, n, dh)

    # Back to concat-heads layout (B*n, inner) so the head-sum is folded into
    # a single lane-dense output projection against the original wo.
    o2d = jnp.concatenate(
        [jnp.concatenate([o_g[b * H + h] for h in range(H)], axis=-1)
         for b in range(B)], axis=0)                       # (B*n, inner)

    o_ref[...] = (jnp.dot(o2d, wo_ref[...], preferred_element_type=jnp.float32)
                  + bo_ref[...])                           # (B*n, dim) + (1, dim)


# --------------------------- one-time parameter prep ---------------------------
def _rotary_cos_sin(seq_len, dim_head, theta=10000.0):
    inv_freq = 1.0 / (theta ** (jnp.arange(0, dim_head, 2, dtype=jnp.float32) / dim_head))
    t = jnp.arange(seq_len, dtype=jnp.float32)
    freqs = jnp.einsum("i,j->ij", t, inv_freq)
    freqs = jnp.concatenate([freqs, freqs], axis=-1)       # (n, dim_head)
    return jnp.cos(freqs), jnp.sin(freqs)


def prepare_attention_params(params, seq_len, batch, heads=HEADS, dim_head=DIM_HEAD):
    """One-time re-layout of weights + rotary tables (outside the jitted step)."""
    inner = heads * dim_head
    wq, wkv, wo, bo = params["wq"], params["wkv"], params["wo"], params["bo"]

    wk = wkv[:, :inner]
    wv = wkv[:, inner:]
    wqkv = jnp.concatenate([wq, wk, wv], axis=1)           # (dim, 3*inner)

    cos, sin = _rotary_cos_sin(seq_len, dim_head)          # (n, dim_head)
    cos2d = jnp.tile(cos, (batch, heads))                  # (B*n, inner)
    sin2d = jnp.tile(sin, (batch, heads))

    # rotate_half as a signed permutation: (t @ R)[j] = -t[j+half] (j<half)
    #                                                    t[j-half] (j>=half)
    half = dim_head // 2
    R = jnp.zeros((dim_head, dim_head), jnp.float32)
    R = R.at[half:, :half].set(-jnp.eye(half, dtype=jnp.float32))
    R = R.at[:half, half:].set(jnp.eye(half, dtype=jnp.float32))
    rot = jnp.kron(jnp.eye(heads, dtype=jnp.float32), R)   # (inner, inner) block-diag

    return {"wqkv": wqkv, "wo": wo, "bo": bo,
            "cos": cos2d, "sin": sin2d, "rot": rot}


# ------------------------------- wrapper / glue --------------------------------
def attention_forward(prepped, x):
    """Fused Pallas forward of Attention(dim=DIM, heads=HEADS, dim_head=DIM_HEAD)."""
    B, n, dim = x.shape
    x2d = x.reshape(B * n, dim)                            # free bitcast

    kernel = functools.partial(_attention_kernel, batch=B, seq=n,
                               heads=HEADS, dim_head=DIM_HEAD)
    y2d = pl.pallas_call(
        kernel,
        out_shape=jax.ShapeDtypeStruct((B * n, dim), jnp.float32),
        # no grid: single invocation, all operands (< 64 KB) whole-array in VMEM
    )(x2d, prepped["wqkv"], prepped["wo"], prepped["bo"],
      prepped["cos"], prepped["sin"], prepped["rot"])
    return y2d.reshape(B, n, dim)


# ------------------------------ plain-JAX reference ----------------------------
def _attention_ref(x, wq, wkv, wo, bo, cos, sin, heads, dim_head):
    B, n, dim = x.shape
    inner = heads * dim_head
    q = x @ wq
    kv = x @ wkv
    k, v = kv[..., :inner], kv[..., inner:]

    def split(t):   # 'b n (h d) -> b h n d'
        return t.reshape(B, n, heads, dim_head).transpose(0, 2, 1, 3)

    q, k, v = split(q), split(k), split(v)

    def rot_half(t):
        t1, t2 = t[..., :dim_head // 2], t[..., dim_head // 2:]
        return jnp.concatenate([-t2, t1], axis=-1)

    q = q * cos + rot_half(q) * sin
    k = k * cos + rot_half(k) * sin
    s = jnp.einsum('bhqd,bhkd->bhqk', q, k) * dim_head ** -0.5
    p = jax.nn.softmax(s, axis=-1)
    o = jnp.einsum('bhqk,bhkd->bhqd', p, v)
    o = o.transpose(0, 2, 1, 3).reshape(B, n, inner)       # 'b h n d -> b n (h d)'
    return o @ wo + bo


# ------------------------------------ main -------------------------------------
if __name__ == "__main__":
    key = jax.random.PRNGKey(0)
    kx, kq, kkv, ko, kb = jax.random.split(key, 5)

    x = jax.random.normal(kx, (BATCH, SEQ, DIM), jnp.float32)
    params = {
        "wq":  (0.02 * jax.random.normal(kq, (DIM, INNER))).astype(jnp.float32),
        "wkv": (0.02 * jax.random.normal(kkv, (DIM, 2 * INNER))).astype(jnp.float32),
        "wo":  (0.02 * jax.random.normal(ko, (INNER, DIM))).astype(jnp.float32),
        "bo":  (0.02 * jax.random.normal(kb, (1, DIM))).astype(jnp.float32),
    }

    # One-time prep (outside the per-step jit): fused QKV weight, rot matrix,
    # tiled cos/sin tables.
    prepped = prepare_attention_params(params, SEQ, BATCH)

    fwd = jax.jit(attention_forward)
    out = fwd(prepped, x)
    jax.block_until_ready(out)

    cos, sin = _rotary_cos_sin(SEQ, DIM_HEAD)
    ref = _attention_ref(x, params["wq"], params["wkv"], params["wo"], params["bo"],
                         cos, sin, HEADS, DIM_HEAD)

    assert out.shape == (BATCH, SEQ, DIM)
    assert bool(jnp.all(jnp.isfinite(out)))
    assert bool(jnp.allclose(out, ref, atol=1e-2, rtol=1e-2)), \
        float(jnp.max(jnp.abs(out - ref)))
    print("KERNEL_OK")
</pallas_src>

<mosaic_0001>
module attributes {stable_mosaic.version = 11 : i64} {
  func.func @_attention_kernel(%arg0: memref<16x32xf32, #tpu.memory_space<vmem>>, %arg1: memref<32x96xf32, #tpu.memory_space<vmem>>, %arg2: memref<32x32xf32, #tpu.memory_space<vmem>>, %arg3: memref<1x32xf32, #tpu.memory_space<vmem>>, %arg4: memref<16x32xf32, #tpu.memory_space<vmem>>, %arg5: memref<16x32xf32, #tpu.memory_space<vmem>>, %arg6: memref<32x32xf32, #tpu.memory_space<vmem>>, %arg7: memref<16x32xf32, #tpu.memory_space<vmem>>) attributes {dimension_semantics = [], scalar_prefetch = 0 : i64, scratch_operands = 0 : i64, tpu.core_type = #tpu.core_type<tc>} {
    %c0 = arith.constant 0 : index
    %c0_0 = arith.constant 0 : index
    %0 = vector.load %arg0[%c0, %c0_0] : memref<16x32xf32, #tpu.memory_space<vmem>>, vector<16x32xf32>
    %c0_1 = arith.constant 0 : index
    %c0_2 = arith.constant 0 : index
    %1 = vector.load %arg1[%c0_1, %c0_2] : memref<32x96xf32, #tpu.memory_space<vmem>>, vector<32x96xf32>
    %cst = arith.constant dense<0.000000e+00> : vector<16x96xf32>
    %2 = tpu.matmul %0, %1, %cst {dimension_numbers = #tpu.dot_dimension_numbers<[1], [0], [0], [1], [0, 0, 1, 1], [], []>} : vector<16x32xf32>, vector<32x96xf32>, vector<16x96xf32> -> vector<16x96xf32>
    %3 = vector.extract_strided_slice %2 {offsets = [0, 0], sizes = [16, 32], strides = [1, 1]} : vector<16x96xf32> to vector<16x32xf32>
    %4 = vector.extract_strided_slice %2 {offsets = [0, 32], sizes = [16, 32], strides = [1, 1]} : vector<16x96xf32> to vector<16x32xf32>
    %5 = vector.extract_strided_slice %2 {offsets = [0, 64], sizes = [16, 32], strides = [1, 1]} : vector<16x96xf32> to vector<16x32xf32>
    %c0_3 = arith.constant 0 : index
    %c0_4 = arith.constant 0 : index
    %6 = vector.load %arg4[%c0_3, %c0_4] : memref<16x32xf32, #tpu.memory_space<vmem>>, vector<16x32xf32>
    %c0_5 = arith.constant 0 : index
    %c0_6 = arith.constant 0 : index
    %7 = vector.load %arg5[%c0_5, %c0_6] : memref<16x32xf32, #tpu.memory_space<vmem>>, vector<16x32xf32>
    %c0_7 = arith.constant 0 : index
    %c0_8 = arith.constant 0 : index
    %8 = vector.load %arg6[%c0_7, %c0_8] : memref<32x32xf32, #tpu.memory_space<vmem>>, vector<32x32xf32>
    %9 = arith.mulf %3, %6 : vector<16x32xf32>
    %cst_9 = arith.constant dense<0.000000e+00> : vector<16x32xf32>
    %10 = tpu.matmul %3, %8, %cst_9 {dimension_numbers = #tpu.dot_dimension_numbers<[1], [0], [0], [1], [0, 0, 1, 1], [], []>} : vector<16x32xf32>, vector<32x32xf32>, vector<16x32xf32> -> vector<16x32xf32>
    %11 = arith.mulf %10, %7 : vector<16x32xf32>
    %12 = arith.addf %9, %11 : vector<16x32xf32>
    %13 = arith.mulf %4, %6 : vector<16x32xf32>
    %cst_10 = arith.constant dense<0.000000e+00> : vector<16x32xf32>
    %14 = tpu.matmul %4, %8, %cst_10 {dimension_numbers = #tpu.dot_dimension_numbers<[1], [0], [0], [1], [0, 0, 1, 1], [], []>} : vector<16x32xf32>, vector<32x32xf32>, vector<16x32xf32> -> vector<16x32xf32>
    %15 = arith.mulf %14, %7 : vector<16x32xf32>
    %16 = arith.addf %13, %15 : vector<16x32xf32>
    %17 = vector.extract_strided_slice %12 {offsets = [0, 0], sizes = [8, 16], strides = [1, 1]} : vector<16x32xf32> to vector<8x16xf32>
    %18 = vector.extract_strided_slice %12 {offsets = [0, 16], sizes = [8, 16], strides = [1, 1]} : vector<16x32xf32> to vector<8x16xf32>
    %19 = vector.extract_strided_slice %12 {offsets = [8, 0], sizes = [8, 16], strides = [1, 1]} : vector<16x32xf32> to vector<8x16xf32>
    %20 = vector.extract_strided_slice %12 {offsets = [8, 16], sizes = [8, 16], strides = [1, 1]} : vector<16x32xf32> to vector<8x16xf32>
    %21 = vector.shape_cast %17 : vector<8x16xf32> to vector<1x8x16xf32>
    %22 = vector.shape_cast %18 : vector<8x16xf32> to vector<1x8x16xf32>
    %23 = vector.shape_cast %19 : vector<8x16xf32> to vector<1x8x16xf32>
    %24 = vector.shape_cast %20 : vector<8x16xf32> to vector<1x8x16xf32>
    %25 = tpu.concatenate %21, %22, %23, %24 in 0 : vector<1x8x16xf32>, vector<1x8x16xf32>, vector<1x8x16xf32>, vector<1x8x16xf32> -> vector<4x8x16xf32>
    %26 = vector.extract_strided_slice %16 {offsets = [0, 0], sizes = [8, 16], strides = [1, 1]} : vector<16x32xf32> to vector<8x16xf32>
    %27 = vector.extract_strided_slice %16 {offsets = [0, 16], sizes = [8, 16], strides = [1, 1]} : vector<16x32xf32> to vector<8x16xf32>
    %28 = vector.extract_strided_slice %16 {offsets = [8, 0], sizes = [8, 16], strides = [1, 1]} : vector<16x32xf32> to vector<8x16xf32>
    %29 = vector.extract_strided_slice %16 {offsets = [8, 16], sizes = [8, 16], strides = [1, 1]} : vector<16x32xf32> to vector<8x16xf32>
    %30 = vector.shape_cast %26 : vector<8x16xf32> to vector<1x8x16xf32>
    %31 = vector.shape_cast %27 : vector<8x16xf32> to vector<1x8x16xf32>
    %32 = vector.shape_cast %28 : vector<8x16xf32> to vector<1x8x16xf32>
    %33 = vector.shape_cast %29 : vector<8x16xf32> to vector<1x8x16xf32>
    %34 = tpu.concatenate %30, %31, %32, %33 in 0 : vector<1x8x16xf32>, vector<1x8x16xf32>, vector<1x8x16xf32>, vector<1x8x16xf32> -> vector<4x8x16xf32>
    %35 = vector.extract_strided_slice %5 {offsets = [0, 0], sizes = [8, 16], strides = [1, 1]} : vector<16x32xf32> to vector<8x16xf32>
    %36 = vector.extract_strided_slice %5 {offsets = [0, 16], sizes = [8, 16], strides = [1, 1]} : vector<16x32xf32> to vector<8x16xf32>
    %37 = vector.extract_strided_slice %5 {offsets = [8, 0], sizes = [8, 16], strides = [1, 1]} : vector<16x32xf32> to vector<8x16xf32>
    %38 = vector.extract_strided_slice %5 {offsets = [8, 16], sizes = [8, 16], strides = [1, 1]} : vector<16x32xf32> to vector<8x16xf32>
    %39 = vector.shape_cast %35 : vector<8x16xf32> to vector<1x8x16xf32>
    %40 = vector.shape_cast %36 : vector<8x16xf32> to vector<1x8x16xf32>
    %41 = vector.shape_cast %37 : vector<8x16xf32> to vector<1x8x16xf32>
    %42 = vector.shape_cast %38 : vector<8x16xf32> to vector<1x8x16xf32>
    %43 = tpu.concatenate %39, %40, %41, %42 in 0 : vector<1x8x16xf32>, vector<1x8x16xf32>, vector<1x8x16xf32>, vector<1x8x16xf32> -> vector<4x8x16xf32>
    "tpu.trace_start"() <{level = 10 : i32, message = "gqd,gkd->gqk"}> : () -> ()
    %cst_11 = arith.constant dense<0.000000e+00> : vector<4x8x8xf32>
    %44 = tpu.matmul %25, %34, %cst_11 {dimension_numbers = #tpu.dot_dimension_numbers<[2], [2], [1], [1], [0, 0, 0, 1, 1, 1], [0], [0]>} : vector<4x8x16xf32>, vector<4x8x16xf32>, vector<4x8x8xf32> -> vector<4x8x8xf32>
    "tpu.trace_stop"() : () -> ()
    %cst_12 = arith.constant 2.500000e-01 : f32
    %45 = vector.broadcast %cst_12 : f32 to vector<4x8x8xf32>
    %46 = arith.mulf %44, %45 : vector<4x8x8xf32>
    %cst_13 = arith.constant dense<0xFF800000> : vector<4x8xf32>
    %47 = vector.multi_reduction <maximumf>, %46, %cst_13 [2] : vector<4x8x8xf32> to vector<4x8xf32>
    %48 = vector.shape_cast %47 : vector<4x8xf32> to vector<4x8x1xf32>
    %49 = vector.broadcast %48 : vector<4x8x1xf32> to vector<4x8x8xf32>
    %50 = arith.subf %46, %49 : vector<4x8x8xf32>
    %51 = math.exp %50 : vector<4x8x8xf32>
    %cst_14 = arith.constant dense<0.000000e+00> : vector<4x8xf32>
    %52 = vector.multi_reduction <add>, %51, %cst_14 [2] : vector<4x8x8xf32> to vector<4x8xf32>
    %53 = vector.shape_cast %52 : vector<4x8xf32> to vector<4x8x1xf32>
    %54 = tpu.reciprocal %53 {approx = true} : vector<4x8x1xf32> -> vector<4x8x1xf32>
    %55 = vector.broadcast %54 : vector<4x8x1xf32> to vector<4x8x8xf32>
    %56 = arith.mulf %51, %55 : vector<4x8x8xf32>
    "tpu.trace_start"() <{level = 10 : i32, message = "gqk,gkd->gqd"}> : () -> ()
    %cst_15 = arith.constant dense<0.000000e+00> : vector<4x8x16xf32>
    %57 = tpu.matmul %56, %43, %cst_15 {dimension_numbers = #tpu.dot_dimension_numbers<[2], [1], [1], [2], [0, 0, 0, 1, 1, 2], [0], [0]>} : vector<4x8x8xf32>, vector<4x8x16xf32>, vector<4x8x16xf32> -> vector<4x8x16xf32>
    "tpu.trace_stop"() : () -> ()
    %58 = vector.extract_strided_slice %57 {offsets = [0, 0, 0], sizes = [1, 8, 16], strides = [1, 1, 1]} : vector<4x8x16xf32> to vector<1x8x16xf32>
    %59 = vector.shape_cast %58 : vector<1x8x16xf32> to vector<8x16xf32>
    %60 = vector.extract_strided_slice %57 {offsets = [1, 0, 0], sizes = [1, 8, 16], strides = [1, 1, 1]} : vector<4x8x16xf32> to vector<1x8x16xf32>
    %61 = vector.shape_cast %60 : vector<1x8x16xf32> to vector<8x16xf32>
    %62 = tpu.concatenate %59, %61 in 1 : vector<8x16xf32>, vector<8x16xf32> -> vector<8x32xf32>
    %63 = vector.extract_strided_slice %57 {offsets = [2, 0, 0], sizes = [1, 8, 16], strides = [1, 1, 1]} : vector<4x8x16xf32> to vector<1x8x16xf32>
    %64 = vector.shape_cast %63 : vector<1x8x16xf32> to vector<8x16xf32>
    %65 = vector.extract_strided_slice %57 {offsets = [3, 0, 0], sizes = [1, 8, 16], strides = [1, 1, 1]} : vector<4x8x16xf32> to vector<1x8x16xf32>
    %66 = vector.shape_cast %65 : vector<1x8x16xf32> to vector<8x16xf32>
    %67 = tpu.concatenate %64, %66 in 1 : vector<8x16xf32>, vector<8x16xf32> -> vector<8x32xf32>
    %68 = tpu.concatenate %62, %67 in 0 : vector<8x32xf32>, vector<8x32xf32> -> vector<16x32xf32>
    %c0_16 = arith.constant 0 : index
    %c0_17 = arith.constant 0 : index
    %69 = vector.load %arg2[%c0_16, %c0_17] : memref<32x32xf32, #tpu.memory_space<vmem>>, vector<32x32xf32>
    %cst_18 = arith.constant dense<0.000000e+00> : vector<16x32xf32>
    %70 = tpu.matmul %68, %69, %cst_18 {dimension_numbers = #tpu.dot_dimension_numbers<[1], [0], [0], [1], [0, 0, 1, 1], [], []>} : vector<16x32xf32>, vector<32x32xf32>, vector<16x32xf32> -> vector<16x32xf32>
    %c0_19 = arith.constant 0 : index
    %c0_20 = arith.constant 0 : index
    %71 = vector.load %arg3[%c0_19, %c0_20] : memref<1x32xf32, #tpu.memory_space<vmem>>, vector<1x32xf32>
    %72 = vector.broadcast %71 : vector<1x32xf32> to vector<16x32xf32>
    %73 = arith.addf %70, %72 : vector<16x32xf32>
    %c0_21 = arith.constant 0 : index
    %c0_22 = arith.constant 0 : index
    %74 = vector.load %arg7[%c0_21, %c0_22] : memref<16x32xf32, #tpu.memory_space<vmem>>, vector<16x32xf32>
    tpu.vector_store %arg7[%c0_21, %c0_22], %73 {strides = array<i32>} : memref<16x32xf32, #tpu.memory_space<vmem>>, vector<16x32xf32>,
    return
  }
}

</mosaic_0001>

<bundles_post_ra>
// kernel: attention_forward.1
= control target key start
LH: loop header
LB: loop body
LE: loop exit
PB: predicated region body
PF: predicated region fallthrough
CT: control target
= control target key end

     0   :  { %12 = vsyncpa [#allocation3], 0  ;;  %s1784_s0 = inlined_call_operand.vmem [shape: f32[16,32], index: 0, kind: input, shape index: {}]   ;;  %s1785_s1 = inlined_call_operand.hbm [shape: f32[32,96], index: 1, kind: input, shape index: {}]   ;;  %s1786_s2 = inlined_call_operand.hbm [shape: f32[32,32], index: 2, kind: input, shape index: {}]   ;;  %s1787_s3 = inlined_call_operand.vmem [shape: f32[1,32], index: 3, kind: input, shape index: {}]   ;;  %s1788_s4 = inlined_call_operand.hbm [shape: f32[16,32], index: 4, kind: input, shape index: {}]   ;;  %s1789_s5 = inlined_call_operand.hbm [shape: f32[16,32], index: 5, kind: input, shape index: {}]   ;;  %s1790_s6 = inlined_call_operand.hbm [shape: f32[32,32], index: 6, kind: input, shape index: {}]   ;;  %s1791_s7 = inlined_call_operand.hbm [shape: f32[16,32], index: 7, kind: output, shape index: {}]  }
   0x1   :  { %13 = vsyncpa [#allocation6], 0 }
   0x2   :  { %14 = vsyncpa [#allocation9], 0 }
   0x3   :  { %15 = vsyncpa [#allocation4], 0  ;;  %s1528_s24 = smov [#allocation5]   ;;  %s1529_s26 = smov [#allocation8]  }
   0x4   :  { %s35_s25 = sshll.u32 %s1528_s24, 4  ;;  %s61_s27 = sshll.u32 %s1529_s26, 4  ;;  %s36_s25 = int_to_ptr.vmem [resolvable:$true] %s35_s25  ;;  %s1583_s27 = int_to_ptr.vmem [resolvable:$true] %s61_s27 }
   0x5   :  { %s1388_s30 = scalar_lea.hbm %s1786_s2, 512 }
   0x6   :  { %p1389_p0 = scmp.ne.s32.totalorder %s1786_s2, %s1388_s30  ;;  %p1392_p1 = scmp.lt.u32.totalorder %s1388_s30, %s1786_s2 }
   0x8   :  { %p1394_p2 = pnand %p1392_p1, %p1389_p0 }
   0xa   :  { %1397 = shalt.err (!%p1394_p2)
}
   0xb   :  { %s1398_s12 = scalar_lea.vmem %s36_s25, 512  ;;  %p1403_p4 = scmp.lt.s32.totalorder %s36_s25, %s36_s25 }
   0xc   :  { %p1399_p3 = scmp.ne.s32.totalorder %s36_s25, %s1398_s12  ;;  %p1404_p5 = scmp.lt.s32.totalorder %s1398_s12, %s1398_s12 }
   0xe   :  { %p1405_p6 = por %p1404_p5, %p1403_p4 }
  0x10   :  { %p1406_p7 = pnand %p1405_p6, %p1399_p3 }
  0x12   :  { %1409 = shalt.err (!%p1406_p7)
}
  0x13   :  { %s1530_s13 = smov 128   ;;  %s1531_s14 = smov 8  }
  0x14   :  { %41 = dma.hbm_to_vmem [thread:$0]  %s1786_s2, 512, %s36_s25, [#allocation6], %s1530_s13, %s1530_s13, %s1531_s14  }
  0x15   :  { %s1410_s19 = scalar_lea.hbm %s1789_s5, 256 }
  0x16   :  { %p1411_p8 = scmp.ne.s32.totalorder %s1789_s5, %s1410_s19  ;;  %p1414_p9 = scmp.lt.u32.totalorder %s1410_s19, %s1789_s5 }
  0x18   :  { %p1416_p10 = pnand %p1414_p9, %p1411_p8 }
  0x1a   :  { %1419 = shalt.err (!%p1416_p10)
}
  0x1b   :  { %s1420_s24 = scalar_lea.vmem %s1583_s27, 256  ;;  %p1425_p12 = scmp.lt.s32.totalorder %s1583_s27, %s1583_s27 }
  0x1c   :  { %p1421_p11 = scmp.ne.s32.totalorder %s1583_s27, %s1420_s24  ;;  %p1426_p13 = scmp.lt.s32.totalorder %s1420_s24, %s1420_s24 }
  0x1e   :  { %p1427_p0 = por %p1426_p13, %p1425_p12 }
  0x20   :  { %p1428_p1 = pnand %p1427_p0, %p1421_p11 }
  0x22   :  { %1431 = shalt.err (!%p1428_p1)
}
  0x23   :  { %67 = dma.hbm_to_vmem [thread:$0]  %s1789_s5, 256, %s1583_s27, [#allocation9], %s1530_s13, %s1530_s13, %s1531_s14  }
  0x24   :  { %s1532_s26 = smov [#allocation2]   ;;  %s1533_s29 = smov [#allocation7]  }
  0x25   :  { %s23_s28 = sshll.u32 %s1532_s26, 4  ;;  %s49_s30 = sshll.u32 %s1533_s29, 4  ;;  %s24_s28 = int_to_ptr.vmem [resolvable:$true] %s23_s28  ;;  %s1620_s30 = int_to_ptr.vmem [resolvable:$true] %s49_s30 }
  0x26   :  { %s1432_s10 = scalar_lea.hbm %s1785_s1, 512 }
  0x27   :  { %p1433_p2 = scmp.ne.s32.totalorder %s1785_s1, %s1432_s10  ;;  %p1436_p3 = scmp.lt.u32.totalorder %s1432_s10, %s1785_s1 }
  0x29   :  { %p1438_p4 = pnand %p1436_p3, %p1433_p2 }
  0x2b   :  { %1441 = shalt.err (!%p1438_p4)
}
  0x2c   :  { %s1442_s5 = scalar_lea.vmem %s24_s28, 512  ;;  %p1447_p6 = scmp.lt.s32.totalorder %s24_s28, %s24_s28 }
  0x2d   :  { %p1443_p5 = scmp.ne.s32.totalorder %s24_s28, %s1442_s5  ;;  %p1448_p7 = scmp.lt.s32.totalorder %s1442_s5, %s1442_s5 }
  0x2f   :  { %p1449_p8 = por %p1448_p7, %p1447_p6 }
  0x31   :  { %p1450_p9 = pnand %p1449_p8, %p1443_p5 }
  0x33   :  { %1453 = shalt.err (!%p1450_p9)
}
  0x34   :  { %29 = dma.hbm_to_vmem [thread:$0]  %s1785_s1, 512, %s24_s28, [#allocation3], %s1530_s13, %s1530_s13, %s1531_s14  }
  0x35   :  { %s1454_s20 = scalar_lea.hbm %s1788_s4, 256 }
  0x36   :  { %p1455_p10 = scmp.ne.s32.totalorder %s1788_s4, %s1454_s20  ;;  %p1458_p11 = scmp.lt.u32.totalorder %s1454_s20, %s1788_s4 }
  0x38   :  { %p1460_p12 = pnand %p1458_p11, %p1455_p10 }
  0x3a   :  { %1463 = shalt.err (!%p1460_p12)
}
  0x3b   :  { %s1464_s2 = scalar_lea.vmem %s1620_s30, 256  ;;  %p1469_p0 = scmp.lt.s32.totalorder %s1620_s30, %s1620_s30 }
  0x3c   :  { %p1465_p13 = scmp.ne.s32.totalorder %s1620_s30, %s1464_s2  ;;  %p1470_p1 = scmp.lt.s32.totalorder %s1464_s2, %s1464_s2 }
  0x3e   :  { %p1471_p2 = por %p1470_p1, %p1469_p0 }
  0x40   :  { %p1472_p3 = pnand %p1471_p2, %p1465_p13 }
  0x42   :  { %1475 = shalt.err (!%p1472_p3)
}
  0x43   :  { %55 = dma.hbm_to_vmem [thread:$0]  %s1788_s4, 256, %s1620_s30, [#allocation6], %s1530_s13, %s1530_s13, %s1531_s14  }
  0x44   :  { %s1534_s26 = smov [#allocation10]   ;;  %s1476_s9 = scalar_lea.hbm %s1790_s6, 512 }
  0x45   :  { %s73_s28 = sshll.u32 %s1534_s26, 4  ;;  %p1477_p4 = scmp.ne.s32.totalorder %s1790_s6, %s1476_s9  ;;  %s74_s28 = int_to_ptr.vmem [resolvable:$true] %s73_s28 }
  0x46   :  { %p1480_p5 = scmp.lt.u32.totalorder %s1476_s9, %s1790_s6 }
  0x48   :  { %p1482_p6 = pnand %p1480_p5, %p1477_p4 }
  0x4a   :  { %1485 = shalt.err (!%p1482_p6)
}
  0x4b   :  { %s1486_s16 = scalar_lea.vmem %s74_s28, 512  ;;  %p1491_p8 = scmp.lt.s32.totalorder %s74_s28, %s74_s28 }
  0x4c   :  { %p1487_p7 = scmp.ne.s32.totalorder %s74_s28, %s1486_s16  ;;  %p1492_p9 = scmp.lt.s32.totalorder %s1486_s16, %s1486_s16 }
  0x4e   :  { %p1493_p10 = por %p1492_p9, %p1491_p8 }
  0x50   :  { %p1494_p11 = pnand %p1493_p10, %p1487_p7 }
  0x52   :  { %1497 = shalt.err (!%p1494_p11)
}
  0x53   :  { %79 = dma.hbm_to_vmem [thread:$0]  %s1790_s6, 512, %s74_s28, [#allocation9], %s1530_s13, %s1530_s13, %s1531_s14  }
  0x54   :  { %1520 = dma.done.wait [#allocation3], 512  }
  0x55   :  { %1521 = vsyncadd [#allocation3], 4294966784 }
  0x56   :  { %1522 = dma.done.wait [#allocation6], 768  }
  0x57   :  { %1523 = vsyncadd [#allocation6], 4294966528 }
  0x58   :  { %1524 = dma.done.wait [#allocation9], 768  }
  0x59   :  { %1525 = vsyncadd [#allocation9], 4294966528  ;;  %vm101_vm0 = vcmask 261120   ;;  %v97_v0 = vld [vmem:[#allocation2] sm:$0xff]  ;;  %v98_v1 = vld [vmem:[#allocation2 + $0x8] sm:$0xff]  ;;  %s1535_s6 = smov 32  }
  0x5a   :  { %v99_v2 = vld [vmem:[#allocation2 + $0x10] sm:$0xff]  ;;  %v1325_v3 = vpack.c.bf16 %v98_v1, %v97_v0  ;;  %v100_v4 = vld [vmem:[#allocation2 + $0x18] sm:$0xff]  ;;  %v95_v5 = vld [vmem:[%s1784_s0] sm:$0xff]  ;;  %s1536_s19 = smov 96   ;;  %v1537_v34 = vmov 0.0   ;;  %vm1538_vm1 = vmmov 0  }
  0x5b   :  { %v1329_v6 = vpack.c.bf16 %v100_v4, %v99_v2  ;;  %1249 = vmatprep.mubr.msk.f32.mxu0 %vm101_vm0, %v95_v5  ;;  %v183_v7 = vld [vmem:[#allocation7] sm:$0xff]  ;;  %v188_v9 = vld [vmem:[#allocation10 + $0x8] sm:$0xff]  ;;  %v189_v11 = vld [vmem:[#allocation10 + $0x10] sm:$0xff]  ;;  %vm401_vm2 = vcmask 130048   ;;  %vm708_vm3 = vcmask 64512   ;;  %s1540_s20 = smov 64  }
  0x5c   :  { %v187_v8 = vld [vmem:[#allocation10] sm:$0xff]  ;;  %1326 = vmatprep.subr.bf16.mxu0 %v1325_v3  ;;  %280 = vrot.lane.b32.xlu1 %v183_v7, %s1535_s6  ;;  %v190_v12 = vld [vmem:[#allocation10 + $0x18] sm:$0xff]  ;;  %v96_v14 = vld [vmem:[%s1784_s0 + $0x8] sm:$0xff]  ;;  %s1539_s0 = smov 112   ;;  %s1541_s21 = smov 16  }
  0x5d   :  { %v1333_v10 = vpack.c.bf16 %v188_v9, %v187_v8  ;;  %1328 = vmatpush3.bf16.msra.mxu0 %v1325_v3  ;;  %v1337_v13 = vpack.c.bf16 %v190_v12, %v189_v11  ;;  %v184_v15 = vld [vmem:[#allocation7 + $0x8] sm:$0xff]  ;;  %v186_v21 = vld [vmem:[#allocation8 + $0x8] sm:$0xff]  ;;  %v185_v22 = vld [vmem:[#allocation8] sm:$0xff]  ;;  %s1542_s24 = smov [#allocation11]  }
  0x5e   :  { %1330 = vmatprep.subr.bf16.mxu0 %v1329_v6  ;;  %s1166_s2 = sshll.u32 %s1542_s24, 4  ;;  %s1167_s2 = int_to_ptr.vmem [resolvable:$true] %s1166_s2 }
  0x5f   :  { %1334 = vmatprep.subr.bf16.mxu1 %v1333_v10  ;;  %s1498_s1 = scalar_lea.vmem %s1167_s2, 256  ;;  %p1503_p13 = scmp.lt.s32.totalorder %s1167_s2, %s1167_s2 }
  0x60   :  { %1336 = vmatpush3.bf16.msra.mxu1 %v1333_v10  ;;  %p1499_p12 = scmp.ne.s32.totalorder %s1167_s2, %s1498_s1  ;;  %p1504_p0 = scmp.lt.s32.totalorder %s1498_s1, %s1498_s1 }
  0x61   :  { %1338 = vmatprep.subr.bf16.mxu1 %v1337_v13  ;;  %1332 = vmatpush3.bf16.msra.mxu0 %v1329_v6 }
  0x62   :  { %1342 = vmatprep.subr.bf16.mxu0 %v1333_v10  ;;  %p1505_p1 = por %p1504_p0, %p1503_p13 }
  0x64   :  { %1340 = vmatpush3.bf16.msra.mxu1 %v1337_v13  ;;  %1250 = vmatmul.mubr.msk.f32.vlgmr.msra.gmra.mrb[0].mxu0 %vm101_vm0, %v96_v14  ;;  %p1506_p2 = pnand %p1505_p1, %p1499_p12 }
  0x65   :  { %1344 = vmatpush3.bf16.msra.mxu0 %v1333_v10  ;;  %1274 = vmatprep.subr.mxu1 %v1537_v34 }
  0x66   :  { %1346 = vmatprep.subr.bf16.mxu0 %v1337_v13 }
  0x69   :  { %1348 = vmatpush3.bf16.msra.mxu0 %v1337_v13 }
  0x6a   :  { %1294 = vmatprep.subr.mxu0 %v1537_v34 }
  0xce   :  { %v281_v35 = vpop.permute.xlu1 %280 }
 0x137   :  { %v1681_v16 = vpop.f32.mrb[0].mxu0 }
 0x138   :  { %v1683_v17 = vpop.f32.mrb[1].mxu0  ;;  %v192_v18 = vmul.f32 %v1681_v16, %v184_v15 }
 0x139   :  { %288 = vrot.lane.b32.xlu0 %v1683_v17, %s1536_s19  ;;  %1260 = vmatprep.mubr.msk.f32.mxu1 %vm101_vm0, %v1683_v17  ;;  %v191_v26 = vmul.f32 %v183_v7, %v1683_v17  ;;  %v286_v36 = vmul.f32 %v281_v35, %v1683_v17 }
 0x13a   :  { %1261 = vmatmul.mubr.msk.f32.vlgmr.msra.gmra.mrb[0].mxu1 %vm101_vm0, %v1681_v16 }
 0x13b   :  { %1276 = vmatprep.mubr.msk.f32.mxu1 %vm1538_vm1, %v1537_v34 }
 0x13d   :  { %290 = vrot.lane.b32.xlu0 %v1681_v16, %s1536_s19 }
 0x141   :  { %282 = vrot.lane.b32.xlu0 %v184_v15, %s1535_s6 }
 0x1ab   :  { %v289_v19 = vpop.permute.xlu0 %288 }
 0x1ac   :  { %1271 = vmatprep.mubr.msk.f32.mxu0 %vm101_vm0, %v289_v19 }
 0x1af   :  { %v291_v20 = vpop.permute.xlu0 %290 }
 0x1b0   :  { %1272 = vmatmul.mubr.msk.f32.vlgmr.msra.gmra.mrb[2].mxu0 %vm101_vm0, %v291_v20 }
 0x1b1   :  { %1296 = vmatprep.mubr.msk.f32.mxu0 %vm1538_vm1, %v1537_v34 }
 0x1b3   :  { %v283_v37 = vpop.permute.xlu0 %282 }
 0x1b4   :  { %v287_v40 = vmul.f32 %v1681_v16, %v283_v37 }
 0x20d   :  { %v1262_v23 = vpop.f32.mrb[0].mxu1 }
 0x20e   :  { %v275_v24 = vmul.f32 %v1262_v23, %v186_v21  ;;  %v265_v25 = vpop.f32.mrb[1].mxu1 }
 0x20f   :  { %v274_v27 = vmul.f32 %v265_v25, %v185_v22 }
 0x210   :  { %v277_v28 = vadd.f32 %v275_v24, %v192_v18 }
 0x211   :  { %v276_v29 = vadd.f32 %v274_v27, %v191_v26 }
 0x283   :  { %v1273_v30 = vpop.f32.mrb[2].mxu0 }
 0x284   :  { %v362_v31 = vpop.f32.mrb[3].mxu0  ;;  %v372_v33 = vmul.f32 %v1273_v30, %v186_v21 }
 0x285   :  { %v371_v32 = vmul.f32 %v362_v31, %v185_v22 }
 0x287   :  { %375 = vrot.lane.b32.xlu1 %v371_v32, %s1535_s6 }
 0x28b   :  { %377 = vrot.lane.b32.xlu1 %v372_v33, %s1535_s6 }
 0x2f9   :  { %v376_v38 = vpop.permute.xlu1 %375 }
 0x2fa   :  { %v381_v39 = vadd.f32 %v376_v38, %v286_v36 }
 0x2fc   :  { %390 = vrot.lane.b32.xlu0 %v381_v39, %s1539_s0 }
 0x2fd   :  { %v378_v41 = vpop.permute.xlu1 %377 }
 0x2fe   :  { %v382_v42 = vadd.f32 %v378_v41, %v287_v40 }
 0x300   :  { %393 = vrot.lane.b32.xlu1 %v382_v42, %s1539_s0  ;;  %399 = vrot.lane.b32.xlu0 %v381_v39, %s1536_s19 }
 0x304   :  { %384 = vrot.lane.b32.xlu0 %v276_v29, %s1539_s0 }
 0x36e   :  { %v391_v43 = vpop.permute.xlu0 %390 }
 0x36f   :  { %476 = vrot.lane.b32.xlu1 %v391_v43, %s1536_s19  ;;  %v1068_v43 = vld [vmem:[#allocation5 + $0x8] sm:$0xff] }
 0x372   :  { %v394_v44 = vpop.permute.xlu1 %393  ;;  %v400_v45 = vpop.permute.xlu0 %399 }
 0x373   :  { %552 = vrot.lane.b32.xlu1 %v382_v42, %s1536_s19  ;;  %1275 = vmatpush3.xpose.msk.msra.mxu1 %vm401_vm2, %v400_v45  ;;  %v1067_v42 = vld [vmem:[#allocation5] sm:$0xff]  ;;  %v1069_v45 = vld [vmem:[#allocation5 + $0x10] sm:$0xff] }
 0x374   :  { %628 = vrot.lane.b32.xlu0 %v394_v44, %s1536_s19  ;;  %1279 = vmatprep.subr.mxu1 %v1537_v34  ;;  %v1349_v44 = vpack.c.bf16 %v1068_v43, %v1067_v42 }
 0x376   :  { %1277 = vmatmul.mubr.msk.f32.vlgmr.msra.gmra.mrb[2].mxu1 %vm401_vm2, %v276_v29  ;;  %v385_v47 = vpop.permute.xlu0 %384 }
 0x377   :  { %387 = vrot.lane.b32.xlu1 %v277_v28, %s1539_s0  ;;  %1281 = vmatprep.mubr.msk.f32.mxu1 %vm1538_vm1, %v1537_v34 }
 0x3e1   :  { %v477_v46 = vpop.permute.xlu1 %476 }
 0x3e2   :  { %1280 = vmatpush3.xpose.msk.msra.mxu1 %vm401_vm2, %v477_v46  ;;  %v1070_v46 = vld [vmem:[#allocation5 + $0x18] sm:$0xff] }
 0x3e3   :  { %1284 = vmatprep.subr.mxu1 %v1537_v34 }
 0x3e5   :  { %v553_v48 = vpop.permute.xlu1 %552  ;;  %1282 = vmatmul.mubr.msk.f32.vlgmr.msra.gmra.mrb[4].mxu1 %vm401_vm2, %v385_v47  ;;  %v1353_v47 = vpack.c.bf16 %v1070_v46, %v1069_v45 }
 0x3e6   :  { %1285 = vmatpush3.xpose.msk.msra.mxu1 %vm401_vm2, %v553_v48  ;;  %1286 = vmatprep.mubr.msk.f32.mxu1 %vm1538_vm1, %v1537_v34  ;;  %v629_v49 = vpop.permute.xlu0 %628 }
 0x3e7   :  { %1289 = vmatprep.subr.mxu1 %v1537_v34 }
 0x3e9   :  { %1287 = vmatmul.mubr.msk.f32.vlgmr.msra.gmra.mrb[6].mxu1 %vm401_vm2, %v277_v28  ;;  %v388_v50 = vpop.permute.xlu1 %387 }
 0x3ea   :  { %1290 = vmatpush3.xpose.msk.msra.mxu1 %vm401_vm2, %v629_v49  ;;  %1291 = vmatprep.mubr.msk.f32.mxu1 %vm1538_vm1, %v1537_v34 }
 0x3eb   :  { %1299 = vmatprep.subr.mxu1 %v1537_v34 }
 0x3ed   :  { %1292 = vmatmul.mubr.msk.f32.vlgmr.msra.gmra.mrb[8].mxu1 %vm401_vm2, %v388_v50 }
 0x3ee   :  { %1301 = vmatprep.mubr.msk.f32.mxu1 %vm1538_vm1, %v1537_v34 }
 0x449   :  { %v472_v51 = vpop.f32.mrb[2].mxu1 }
 0x44a   :  { %v1278_v52 = vpop.f32.mrb[3].mxu1  ;;  %v704_v62 = vmul.f32 0.25, %v472_v51 }
 0x44c   :  { %v709_v0 = vsel %vm708_vm3, %v704_v62, -inf }
 0x4b8   :  { %v548_v53 = vpop.f32.mrb[4].mxu1 }
 0x4b9   :  { %v705_v54 = vmul.f32 0.25, %v548_v53  ;;  %v1283_v55 = vpop.f32.mrb[5].mxu1 }
 0x4bb   :  { %v712_v56 = vsel %vm708_vm3, %v705_v54, -inf }
 0x4bc   :  { %713 = vmax.xlane.f32.xlu0 %v712_v56  ;;  %v624_v57 = vpop.f32.mrb[6].mxu1 }
 0x4bd   :  { %v1288_v58 = vpop.f32.mrb[7].mxu1  ;;  %v706_v1 = vmul.f32 0.25, %v624_v57 }
 0x4bf   :  { %v715_v2 = vsel %vm708_vm3, %v706_v1, -inf }
 0x4c0   :  { %v700_v59 = vpop.f32.mrb[8].mxu1 }
 0x4c1   :  { %v707_v60 = vmul.f32 0.25, %v700_v59  ;;  %v1293_v61 = vpop.f32.mrb[9].mxu1  ;;  %v1198_v59 = vld [vmem:[%s1787_s3] ss:$0 sm:$0xff] }
 0x4c3   :  { %v718_v63 = vsel %vm708_vm3, %v707_v60, -inf }
 0x4c4   :  { %719 = vmax.xlane.f32.xlu1 %v718_v63 }
 0x4c8   :  { %710 = vmax.xlane.f32.xlu1 %v709_v0 }
 0x4d2   :  { %395 = vrot.lane.b32.xlu0 %v1683_v17, %s1539_s0 }
 0x4d9   :  { %397 = vrot.lane.b32.xlu1 %v1681_v16, %s1539_s0 }
 0x4f1   :  { %716 = vmax.xlane.f32.xlu0 %v715_v2 }
 0x549   :  { %v714_v3 = vpop.xlane.xlu0 %713 }
 0x54a   :  { %v722_v4 = vsub.f32 %v705_v54, %v714_v3 }
 0x54c   :  { %v727_v5 = vmul.f32 1.442695, %v722_v4 }
 0x54d   :  { %v396_v15 = vpop.permute.xlu0 %395 }
 0x54e   :  { %1372 = vpow2.f32 %v727_v5 }
 0x551   :  { %v720_v6 = vpop.xlane.xlu1 %719 }
 0x552   :  { %v724_v7 = vsub.f32 %v707_v60, %v720_v6 }
 0x554   :  { %v731_v8 = vmul.f32 1.442695, %v724_v7 }
 0x555   :  { %v711_v13 = vpop.xlane.xlu1 %710 }
 0x556   :  { %1374 = vpow2.f32 %v731_v8  ;;  %v721_v20 = vsub.f32 %v704_v62, %v711_v13 }
 0x558   :  { %v1373_v9 = vpop.eup %1372  ;;  %v725_v22 = vmul.f32 1.442695, %v721_v20 }
 0x559   :  { %v736_v10 = vsel %vm708_vm3, %v1373_v9, 0.0  ;;  %v398_v14 = vpop.permute.xlu1 %397 }
 0x55a   :  { %737 = vadd.xlane.f32.xlu1 %v736_v10 }
 0x560   :  { %v1375_v11 = vpop.eup %1374 }
 0x561   :  { %v742_v12 = vsel %vm708_vm3, %v1375_v11, 0.0 }
 0x562   :  { %743 = vadd.xlane.f32.xlu0 %v742_v12 }
 0x56b   :  { %981 = vrot.lane.b32.xlu1 %v398_v14, %s1540_s20 }
 0x578   :  { %829 = vrot.lane.b32.xlu0 %v396_v15, %s1540_s20 }
 0x57e   :  { %v717_v18 = vpop.xlane.xlu0 %716 }
 0x57f   :  { %v723_v19 = vsub.f32 %v706_v1, %v717_v18 }
 0x581   :  { %v729_v21 = vmul.f32 1.442695, %v723_v19 }
 0x583   :  { %1376 = vpow2.f32 %v729_v21 }
 0x584   :  { %1378 = vpow2.f32 %v725_v22 }
 0x58d   :  { %v1377_v23 = vpop.eup %1376 }
 0x58e   :  { %v739_v24 = vsel %vm708_vm3, %v1377_v23, 0.0  ;;  %v1379_v25 = vpop.eup %1378 }
 0x58f   :  { %740 = vadd.xlane.f32.xlu1 %v739_v24  ;;  %v733_v26 = vsel %vm708_vm3, %v1379_v25, 0.0 }
 0x597   :  { %734 = vadd.xlane.f32.xlu0 %v733_v26 }
 0x5a0   :  { %905 = vrot.lane.b32.xlu1 %v1681_v16, %s1540_s20 }
 0x5ad   :  { %753 = vrot.lane.b32.xlu0 %v1683_v17, %s1540_s20 }
 0x5e7   :  { %v738_v27 = vpop.xlane.xlu1 %737 }
 0x5e8   :  { %1380 = vrcp.f32 %v738_v27 }
 0x5eb   :  { %v982_v32 = vpop.permute.xlu1 %981 }
 0x5ef   :  { %v744_v28 = vpop.xlane.xlu0 %743 }
 0x5f0   :  { %1382 = vrcp.f32 %v744_v28 }
 0x5f2   :  { %v1381_v29 = vpop.eup %1380 }
 0x5f3   :  { %v750_v30 = vmul.f32 %v1381_v29, %v1373_v9  ;;  %v830_v31 = vpop.permute.xlu0 %829 }
 0x5f4   :  { %1300 = vmatpush3.msra.mxu1 %v830_v31 }
 0x5f5   :  { %1302 = vmatmul.mubr.msk.f32.vlgmr.msra.gmra.mrb[10].mxu1 %vm708_vm3, %v750_v30  ;;  %1309 = vmatprep.subr.mxu1 %v1537_v34 }
 0x5f6   :  { %1310 = vmatpush3.msra.mxu1 %v982_v32  ;;  %1311 = vmatprep.mubr.msk.f32.mxu1 %vm1538_vm1, %v1537_v34 }
 0x5fa   :  { %v1383_v16 = vpop.eup %1382 }
 0x5fb   :  { %v752_v33 = vmul.f32 %v1383_v16, %v1375_v11 }
 0x5fd   :  { %1312 = vmatmul.mubr.msk.f32.vlgmr.msra.gmra.mrb[12].mxu1 %vm708_vm3, %v752_v33 }
 0x61c   :  { %v741_v17 = vpop.xlane.xlu1 %740 }
 0x620   :  { %v906_v40 = vpop.permute.xlu1 %905 }
 0x624   :  { %v735_v35 = vpop.xlane.xlu0 %734 }
 0x625   :  { %1384 = vrcp.f32 %v735_v35 }
 0x626   :  { %1386 = vrcp.f32 %v741_v17 }
 0x628   :  { %v754_v36 = vpop.permute.xlu0 %753 }
 0x629   :  { %1295 = vmatpush3.msra.mxu0 %v754_v36 }
 0x62a   :  { %1304 = vmatprep.subr.mxu0 %v1537_v34 }
 0x62f   :  { %v1385_v37 = vpop.eup %1384 }
 0x630   :  { %v749_v38 = vmul.f32 %v1385_v37, %v1379_v25  ;;  %v1387_v39 = vpop.eup %1386 }
 0x631   :  { %v751_v41 = vmul.f32 %v1387_v39, %v1377_v23 }
 0x632   :  { %1297 = vmatmul.mubr.msk.f32.vlgmr.msra.gmra.mrb[4].mxu0 %vm708_vm3, %v749_v38 }
 0x633   :  { %1305 = vmatpush3.msra.mxu0 %v906_v40  ;;  %1306 = vmatprep.mubr.msk.f32.mxu0 %vm1538_vm1, %v1537_v34 }
 0x634   :  { %1350 = vmatprep.subr.bf16.mxu0 %v1349_v44 }
 0x636   :  { %1307 = vmatmul.mubr.msk.f32.vlgmr.msra.gmra.mrb[6].mxu0 %vm708_vm3, %v751_v41 }
 0x637   :  { %1352 = vmatpush3.bf16.msra.mxu0 %v1349_v44 }
 0x638   :  { %1354 = vmatprep.subr.bf16.mxu0 %v1353_v47 }
 0x63b   :  { %1356 = vmatpush3.bf16.msra.mxu0 %v1353_v47 }
 0x6c8   :  { %v901_v48 = vpop.f32.mrb[10].mxu1 }
 0x6c9   :  { %1058 = vrot.lane.b32.xlu0 %v901_v48, %s1541_s21  ;;  %v1303_v49 = vpop.f32.mrb[11].mxu1 }
 0x6d0   :  { %v1053_v50 = vpop.f32.mrb[12].mxu1 }
 0x6d1   :  { %1063 = vrot.lane.b32.xlu1 %v1053_v50, %s1541_s21  ;;  %v1313_v34 = vpop.f32.mrb[13].mxu1 }
 0x705   :  { %v825_v51 = vpop.f32.mrb[4].mxu0 }
 0x706   :  { %v1298_v52 = vpop.f32.mrb[5].mxu0 }
 0x709   :  { %v977_v53 = vpop.f32.mrb[6].mxu0 }
 0x70a   :  { %v1308_v54 = vpop.f32.mrb[7].mxu0 }
 0x73b   :  { %v1059_v55 = vpop.permute.xlu0 %1058 }
 0x73c   :  { %v1061_v56 = vsel %vm401_vm2, %v825_v51, %v1059_v55 }
 0x73d   :  { %1322 = vmatprep.mubr.msk.f32.mxu0 %vm101_vm0, %v1061_v56 }
 0x743   :  { %v1064_v57 = vpop.permute.xlu1 %1063 }
 0x744   :  { %v1066_v58 = vsel %vm401_vm2, %v977_v53, %v1064_v57 }
 0x745   :  { %1323 = vmatmul.mubr.msk.f32.vlgmr.msra.gmra.mrb[8].mxu0 %vm101_vm0, %v1066_v58 }
 0x818   :  { %v1324_v60 = vpop.f32.mrb[8].mxu0 }
 0x819   :  { %v1156_v61 = vadd.f32 %v1324_v60, %v1198_v59  ;;  %v1150_v62 = vpop.f32.mrb[9].mxu0 }
 0x81a   :  { %v1151_v63 = vadd.f32 %v1198_v59, %v1150_v62 }
 0x81b   :  { %1160 = vst.msk [vmem:[#allocation11 + $0x8] sm:$0xff] %vm101_vm0, %v1156_v61 }
 0x81c   :  { %1159 = vst.msk [vmem:[#allocation11] sm:$0xff] %vm101_vm0, %v1151_v63 }
 0x81d   :  { %1509 = shalt.err (!%p1506_p2)
}
 0x81e   :  { %s1510_s26 = scalar_lea.hbm %s1791_s7, 256 }
 0x81f   :  { %p1511_p3 = scmp.ne.s32.totalorder %s1791_s7, %s1510_s26  ;;  %p1514_p4 = scmp.lt.u32.totalorder %s1510_s26, %s1791_s7 }
 0x821   :  { %p1516_p5 = pnand %p1514_p4, %p1511_p3 }
 0x823   :  { %1519 = shalt.err (!%p1516_p5)
}
 0x824   :  { %1172 = dma.vmem_to_hbm [thread:$0]  %s1167_s2, 256, %s1791_s7, [#allocation4], %s1530_s13, %s1530_s13, %s1531_s14  }
 0x825   :  { %1526 = dma.done.wait [#allocation4], 256  }
 0x826   :  { %1527 = vsyncadd [#allocation4], 4294967040 }
 0x827   :  { %1176 = vsyncpa [#allocation3], 1 }
 0x828   :  { %1177 = vsyncpa [#allocation6], 1 }
 0x829   :  { %1178 = vsyncpa [#allocation9], 1 }
 0x82a   :  { %1179 = vsyncpa [#allocation4], 1 }

</bundles_post_ra>
